<compile_context>
chip_gen: v7x
topology: tpu7x:2x2x1
jax: 0.10.0
libtpu: 0.0.40
codegen_flags: <defaults>
</compile_context>

<pallas_src>
import functools

import jax
import jax.numpy as jnp
from jax.experimental import pallas as pl
from jax.experimental.pallas import tpu as pltpu


# ----------------------------- in-kernel helpers ----------------------------

def _ln(x, g, b, eps=1e-5):
    """LayerNorm over the last dim (torch.nn.LayerNorm defaults, eps=1e-5)."""
    mu = jnp.mean(x, axis=-1, keepdims=True)
    xc = x - mu
    var = jnp.mean(xc * xc, axis=-1, keepdims=True)
    return xc * jax.lax.rsqrt(var + eps) * g + b


def _softmax_rows(s):
    s = s - jnp.max(s, axis=-1, keepdims=True)
    p = jnp.exp(s)
    # EUP reciprocal + VALU multiply instead of a VALU divide.
    return p * pl.reciprocal(jnp.sum(p, axis=-1, keepdims=True), approx=True)


def _mha(q, kv, heads, dim_head):
    """q: (Nq, inner); kv: (Nk, 2*inner) packed [k | v]. Heads via static slices."""
    inner = heads * dim_head
    scale = dim_head ** -0.5
    parts = []
    for h in range(heads):
        lo, hi = h * dim_head, (h + 1) * dim_head
        qh = q[:, lo:hi] * scale                 # scale the small (Nq, dh) tile
        kh = kv[:, lo:hi]
        vh = kv[:, inner + lo:inner + hi]
        s = jax.lax.dot_general(qh, kh, (((1,), (1,)), ((), ())),
                                preferred_element_type=jnp.float32)
        p = _softmax_rows(s)
        parts.append(jnp.dot(p, vh, preferred_element_type=jnp.float32))
    return parts[0] if heads == 1 else jnp.concatenate(parts, axis=-1)


def _row_tile(m, cap=512):
    """Largest row tile <= cap dividing m (multiple of 8 when possible)."""
    if m <= cap:
        return m
    for t in (cap, 256, 128, 64, 32, 16, 8):
        if m % t == 0:
            return t
    return m


def _w(shape):
    """Constant-index full-block spec for weights / LN params (1-D grid)."""
    zeros = (0,) * len(shape)
    return pl.BlockSpec(shape, lambda i, z=zeros: z)


_PAR = pltpu.CompilerParams(dimension_semantics=("parallel",))


# ----------------------- PreNorm + self-Attention kernel ---------------------

def _self_attn_kernel(x_ref, g_ref, b_ref, wqkv_ref, wo_ref, bo_ref, o_ref,
                      *, heads, dim_head):
    x = x_ref[0]                                               # (N, D)
    xn = _ln(x, g_ref[...], b_ref[...])                        # PreNorm(x)
    inner = heads * dim_head
    qkv = jnp.dot(xn, wqkv_ref[...], preferred_element_type=jnp.float32)
    o = _mha(qkv[:, :inner], qkv[:, inner:], heads, dim_head)
    out = jnp.dot(o, wo_ref[...], preferred_element_type=jnp.float32) + bo_ref[...]
    o_ref[0] = out.astype(o_ref.dtype)


def prenorm_self_attention(x, p, heads, dim_head):
    b, n, d = x.shape
    inner = heads * dim_head
    kern = functools.partial(_self_attn_kernel, heads=heads, dim_head=dim_head)
    return pl.pallas_call(
        kern,
        out_shape=jax.ShapeDtypeStruct((b, n, d), x.dtype),
        grid=(b,),
        in_specs=[pl.BlockSpec((1, n, d), lambda i: (i, 0, 0)),
                  _w((1, d)), _w((1, d)),
                  _w((d, 3 * inner)), _w((inner, d)), _w((1, d))],
        out_specs=pl.BlockSpec((1, n, d), lambda i: (i, 0, 0)),
        compiler_params=_PAR,
    )(x, p['ng'], p['nb'], p['wqkv'], p['wo'], p['bo'])


# --------------------- PreNorm + cross-Attention kernel ----------------------

def _cross_attn_kernel(x_ref, ctx_ref, g_ref, b_ref, cg_ref, cb_ref,
                       wq_ref, wkv_ref, wo_ref, bo_ref, o_ref,
                       *, heads, dim_head):
    x = x_ref[0]                                               # (Nq, Dq)
    ctx = ctx_ref[0]                                           # (Nk, Dc)
    xn = _ln(x, g_ref[...], b_ref[...])                        # PreNorm(x)
    cn = _ln(ctx, cg_ref[...], cb_ref[...])                    # PreNorm norm_context
    q = jnp.dot(xn, wq_ref[...], preferred_element_type=jnp.float32)
    kv = jnp.dot(cn, wkv_ref[...], preferred_element_type=jnp.float32)
    o = _mha(q, kv, heads, dim_head)
    out = jnp.dot(o, wo_ref[...], preferred_element_type=jnp.float32) + bo_ref[...]
    o_ref[0] = out.astype(o_ref.dtype)


def prenorm_cross_attention(x, ctx, p, heads, dim_head):
    b, nq, dq = x.shape
    _, nk, dc = ctx.shape
    inner = heads * dim_head
    kern = functools.partial(_cross_attn_kernel, heads=heads, dim_head=dim_head)
    return pl.pallas_call(
        kern,
        out_shape=jax.ShapeDtypeStruct((b, nq, dq), x.dtype),
        grid=(b,),
        in_specs=[pl.BlockSpec((1, nq, dq), lambda i: (i, 0, 0)),
                  pl.BlockSpec((1, nk, dc), lambda i: (i, 0, 0)),
                  _w((1, dq)), _w((1, dq)), _w((1, dc)), _w((1, dc)),
                  _w((dq, inner)), _w((dc, 2 * inner)),
                  _w((inner, dq)), _w((1, dq))],
        out_specs=pl.BlockSpec((1, nq, dq), lambda i: (i, 0, 0)),
        compiler_params=_PAR,
    )(x, ctx, p['ng'], p['nb'], p['cng'], p['cnb'],
      p['wq'], p['wkv'], p['wo'], p['bo'])


# ------------------------ PreNorm + GEGLU FF kernel --------------------------

def _geglu_ff_kernel(x_ref, g_ref, b_ref, w1_ref, b1_ref, w2_ref, b2_ref, o_ref):
    x = x_ref[...]                                             # (tm, D)
    xn = _ln(x, g_ref[...], b_ref[...])                        # PreNorm(x)
    h = jnp.dot(xn, w1_ref[...], preferred_element_type=jnp.float32) + b1_ref[...]
    d = h.shape[-1] // 2
    a, gate = h[:, :d], h[:, d:]
    # TODO(synk): torch F.gelu is erf-based; tanh approximation used here.
    y = a * jax.nn.gelu(gate, approximate=True)
    out = jnp.dot(y, w2_ref[...], preferred_element_type=jnp.float32) + b2_ref[...]
    o_ref[...] = out.astype(o_ref.dtype)


def prenorm_geglu_ff(x, p):
    b, n, d = x.shape
    m = b * n
    tm = _row_tile(m)
    hid2 = p['w1'].shape[1]
    hid = hid2 // 2
    out2 = pl.pallas_call(
        _geglu_ff_kernel,
        out_shape=jax.ShapeDtypeStruct((m, d), x.dtype),
        grid=(m // tm,),
        in_specs=[pl.BlockSpec((tm, d), lambda i: (i, 0)),
                  _w((1, d)), _w((1, d)),
                  _w((d, hid2)), _w((1, hid2)),
                  _w((hid, d)), _w((1, d))],
        out_specs=pl.BlockSpec((tm, d), lambda i: (i, 0)),
        compiler_params=_PAR,
    )(x.reshape(m, d), p['ng'], p['nb'], p['w1'], p['b1'], p['w2'], p['b2'])
    return out2.reshape(b, n, d)


# --------------------------- pure-JAX references ------------------------------

def _ref_ln(x, g, b, eps=1e-5):
    mu = jnp.mean(x, axis=-1, keepdims=True)
    var = jnp.mean((x - mu) ** 2, axis=-1, keepdims=True)
    return (x - mu) * jax.lax.rsqrt(var + eps) * g + b


def _ref_attn(q, k, v, heads, dim_head):
    b, nq, inner = q.shape
    nk = k.shape[1]
    qh = q.reshape(b, nq, heads, dim_head).transpose(0, 2, 1, 3)
    kh = k.reshape(b, nk, heads, dim_head).transpose(0, 2, 1, 3)
    vh = v.reshape(b, nk, heads, dim_head).transpose(0, 2, 1, 3)
    s = jnp.einsum('bhqd,bhkd->bhqk', qh, kh) * dim_head ** -0.5
    p = jax.nn.softmax(s, axis=-1)
    o = jnp.einsum('bhqk,bhkd->bhqd', p, vh)
    return o.transpose(0, 2, 1, 3).reshape(b, nq, inner)


def ref_prenorm_self_attn(x, p, heads, dim_head):
    xn = _ref_ln(x, p['ng'], p['nb'])
    inner = heads * dim_head
    qkv = xn @ p['wqkv']
    q, k, v = qkv[..., :inner], qkv[..., inner:2 * inner], qkv[..., 2 * inner:]
    return _ref_attn(q, k, v, heads, dim_head) @ p['wo'] + p['bo']


def ref_prenorm_cross_attn(x, ctx, p, heads, dim_head):
    xn = _ref_ln(x, p['ng'], p['nb'])
    cn = _ref_ln(ctx, p['cng'], p['cnb'])
    inner = heads * dim_head
    q = xn @ p['wq']
    kv = cn @ p['wkv']
    k, v = kv[..., :inner], kv[..., inner:]
    return _ref_attn(q, k, v, heads, dim_head) @ p['wo'] + p['bo']


def ref_prenorm_geglu_ff(x, p):
    xn = _ref_ln(x, p['ng'], p['nb'])
    h = xn @ p['w1'] + p['b1']
    d = h.shape[-1] // 2
    a, gate = h[..., :d], h[..., d:]
    return (a * jax.nn.gelu(gate, approximate=True)) @ p['w2'] + p['b2']


# ------------------------------- parameters ----------------------------------

def init_params(key, dim, ctx_dim, heads, dim_head, cross_heads, cross_dim_head,
                ff_mult=4):
    keys = iter(jax.random.split(key, 64))

    def dense(i, o):
        return jax.random.normal(next(keys), (i, o), jnp.float32) * 0.02

    def bias(o):
        return jnp.zeros((1, o), jnp.float32)

    def ln(d):
        return jnp.ones((1, d), jnp.float32), jnp.zeros((1, d), jnp.float32)

    inner = heads * dim_head
    ng, nb = ln(dim)
    self_attn = {'ng': ng, 'nb': nb,
                 'wqkv': dense(dim, 3 * inner),            # packed q|k|v
                 'wo': dense(inner, dim), 'bo': bias(dim)}

    cinner = cross_heads * cross_dim_head
    ng2, nb2 = ln(dim)
    cng, cnb = ln(ctx_dim)
    cross_attn = {'ng': ng2, 'nb': nb2, 'cng': cng, 'cnb': cnb,
                  'wq': dense(dim, cinner), 'wkv': dense(ctx_dim, 2 * cinner),
                  'wo': dense(cinner, dim), 'bo': bias(dim)}

    ng3, nb3 = ln(dim)
    ff = {'ng': ng3, 'nb': nb3,
          'w1': dense(dim, dim * ff_mult * 2), 'b1': bias(dim * ff_mult * 2),
          'w2': dense(dim * ff_mult, dim), 'b2': bias(dim)}

    return self_attn, cross_attn, ff


# ---------------------------------- main --------------------------------------

if __name__ == "__main__":
    B, N, NK = 2, 16, 32
    DIM, CTX_DIM = 64, 96
    HEADS, DIM_HEAD = 4, 16            # self-attention config (inner = 64)
    C_HEADS, C_DIM_HEAD = 2, 32        # cross-attention config (inner = 64)

    root = jax.random.PRNGKey(0)
    k_p, k_x, k_c = jax.random.split(root, 3)
    sa_p, ca_p, ff_p = init_params(k_p, DIM, CTX_DIM, HEADS, DIM_HEAD,
                                   C_HEADS, C_DIM_HEAD)

    x = jax.random.normal(k_x, (B, N, DIM), jnp.float32)
    ctx = jax.random.normal(k_c, (B, NK, CTX_DIM), jnp.float32)

    sa_fn = jax.jit(functools.partial(prenorm_self_attention,
                                      heads=HEADS, dim_head=DIM_HEAD))
    ca_fn = jax.jit(functools.partial(prenorm_cross_attention,
                                      heads=C_HEADS, dim_head=C_DIM_HEAD))
    ff_fn = jax.jit(prenorm_geglu_ff)

    y_sa = jax.block_until_ready(sa_fn(x, sa_p))
    y_ca = jax.block_until_ready(ca_fn(x, ctx, ca_p))
    y_ff = jax.block_until_ready(ff_fn(x, ff_p))

    assert y_sa.shape == (B, N, DIM)
    assert y_ca.shape == (B, N, DIM)
    assert y_ff.shape == (B, N, DIM)

    r_sa = ref_prenorm_self_attn(x, sa_p, HEADS, DIM_HEAD)
    r_ca = ref_prenorm_cross_attn(x, ctx, ca_p, C_HEADS, C_DIM_HEAD)
    r_ff = ref_prenorm_geglu_ff(x, ff_p)

    assert bool(jnp.all(jnp.isfinite(y_sa)))
    assert bool(jnp.all(jnp.isfinite(y_ca)))
    assert bool(jnp.all(jnp.isfinite(y_ff)))
    assert bool(jnp.allclose(y_sa, r_sa, atol=2e-2, rtol=2e-2))
    assert bool(jnp.allclose(y_ca, r_ca, atol=2e-2, rtol=2e-2))
    assert bool(jnp.allclose(y_ff, r_ff, atol=2e-2, rtol=2e-2))

    print("KERNEL_OK")
</pallas_src>

<mosaic_0001>
module attributes {stable_mosaic.version = 11 : i64} {
  func.func @_self_attn_kernel(%arg0: i32, %arg1: memref<1x16x64xf32, #tpu.memory_space<vmem>>, %arg2: memref<1x64xf32, #tpu.memory_space<vmem>>, %arg3: memref<1x64xf32, #tpu.memory_space<vmem>>, %arg4: memref<64x192xf32, #tpu.memory_space<vmem>>, %arg5: memref<64x64xf32, #tpu.memory_space<vmem>>, %arg6: memref<1x64xf32, #tpu.memory_space<vmem>>, %arg7: memref<1x16x64xf32, #tpu.memory_space<vmem>>) attributes {dimension_semantics = [#tpu.dimension_semantics<parallel>], iteration_bounds = array<i64: 2>, scalar_prefetch = 0 : i64, scratch_operands = 0 : i64, tpu.core_type = #tpu.core_type<tc>, window_params = [{transform_indices = @transform_0, window_bounds = array<i64: 1, 16, 64>}, {pipeline_mode = #tpu.pipeline_mode<synchronous>, transform_indices = @transform_1, window_bounds = array<i64: 1, 64>}, {pipeline_mode = #tpu.pipeline_mode<synchronous>, transform_indices = @transform_2, window_bounds = array<i64: 1, 64>}, {pipeline_mode = #tpu.pipeline_mode<synchronous>, transform_indices = @transform_3, window_bounds = array<i64: 64, 192>}, {pipeline_mode = #tpu.pipeline_mode<synchronous>, transform_indices = @transform_4, window_bounds = array<i64: 64, 64>}, {pipeline_mode = #tpu.pipeline_mode<synchronous>, transform_indices = @transform_5, window_bounds = array<i64: 1, 64>}, {transform_indices = @transform_6, window_bounds = array<i64: 1, 16, 64>}]} {
    %c0 = arith.constant 0 : index
    %c0_0 = arith.constant 0 : index
    %c0_1 = arith.constant 0 : index
    %0 = vector.load %arg1[%c0, %c0_0, %c0_1] : memref<1x16x64xf32, #tpu.memory_space<vmem>>, vector<1x16x64xf32>
    %1 = vector.shape_cast %0 : vector<1x16x64xf32> to vector<16x64xf32>
    %c0_2 = arith.constant 0 : index
    %c0_3 = arith.constant 0 : index
    %2 = vector.load %arg2[%c0_2, %c0_3] : memref<1x64xf32, #tpu.memory_space<vmem>>, vector<1x64xf32>
    %c0_4 = arith.constant 0 : index
    %c0_5 = arith.constant 0 : index
    %3 = vector.load %arg3[%c0_4, %c0_5] : memref<1x64xf32, #tpu.memory_space<vmem>>, vector<1x64xf32>
    %cst = arith.constant dense<0.000000e+00> : vector<16xf32>
    %4 = vector.multi_reduction <add>, %1, %cst [1] : vector<16x64xf32> to vector<16xf32>
    %5 = vector.shape_cast %4 : vector<16xf32> to vector<16x1xf32>
    %cst_6 = arith.constant 6.400000e+01 : f32
    %6 = vector.broadcast %cst_6 : f32 to vector<16x1xf32>
    %7 = arith.divf %5, %6 : vector<16x1xf32>
    %8 = vector.broadcast %7 : vector<16x1xf32> to vector<16x64xf32>
    %9 = arith.subf %1, %8 : vector<16x64xf32>
    %10 = arith.mulf %9, %9 : vector<16x64xf32>
    %cst_7 = arith.constant dense<0.000000e+00> : vector<16xf32>
    %11 = vector.multi_reduction <add>, %10, %cst_7 [1] : vector<16x64xf32> to vector<16xf32>
    %12 = vector.shape_cast %11 : vector<16xf32> to vector<16x1xf32>
    %cst_8 = arith.constant 6.400000e+01 : f32
    %13 = vector.broadcast %cst_8 : f32 to vector<16x1xf32>
    %14 = arith.divf %12, %13 : vector<16x1xf32>
    %cst_9 = arith.constant 9.99999974E-6 : f32
    %15 = vector.broadcast %cst_9 : f32 to vector<16x1xf32>
    %16 = arith.addf %14, %15 : vector<16x1xf32>
    %17 = math.rsqrt %16 : vector<16x1xf32>
    %18 = vector.broadcast %17 : vector<16x1xf32> to vector<16x64xf32>
    %19 = arith.mulf %9, %18 : vector<16x64xf32>
    %20 = vector.broadcast %2 : vector<1x64xf32> to vector<16x64xf32>
    %21 = arith.mulf %19, %20 : vector<16x64xf32>
    %22 = vector.broadcast %3 : vector<1x64xf32> to vector<16x64xf32>
    %23 = arith.addf %21, %22 : vector<16x64xf32>
    %c0_10 = arith.constant 0 : index
    %c0_11 = arith.constant 0 : index
    %24 = vector.load %arg4[%c0_10, %c0_11] : memref<64x192xf32, #tpu.memory_space<vmem>>, vector<64x192xf32>
    %cst_12 = arith.constant dense<0.000000e+00> : vector<16x192xf32>
    %25 = tpu.matmul %23, %24, %cst_12 {dimension_numbers = #tpu.dot_dimension_numbers<[1], [0], [0], [1], [0, 0, 1, 1], [], []>} : vector<16x64xf32>, vector<64x192xf32>, vector<16x192xf32> -> vector<16x192xf32>
    %26 = vector.extract_strided_slice %25 {offsets = [0, 0], sizes = [16, 64], strides = [1, 1]} : vector<16x192xf32> to vector<16x64xf32>
    %27 = vector.extract_strided_slice %25 {offsets = [0, 64], sizes = [16, 128], strides = [1, 1]} : vector<16x192xf32> to vector<16x128xf32>
    %28 = vector.extract_strided_slice %26 {offsets = [0, 0], sizes = [16, 16], strides = [1, 1]} : vector<16x64xf32> to vector<16x16xf32>
    %cst_13 = arith.constant 2.500000e-01 : f32
    %29 = vector.broadcast %cst_13 : f32 to vector<16x16xf32>
    %30 = arith.mulf %28, %29 : vector<16x16xf32>
    %31 = vector.extract_strided_slice %27 {offsets = [0, 0], sizes = [16, 16], strides = [1, 1]} : vector<16x128xf32> to vector<16x16xf32>
    %32 = vector.extract_strided_slice %27 {offsets = [0, 64], sizes = [16, 16], strides = [1, 1]} : vector<16x128xf32> to vector<16x16xf32>
    %cst_14 = arith.constant dense<0.000000e+00> : vector<16x16xf32>
    %33 = tpu.matmul %30, %31, %cst_14 {dimension_numbers = #tpu.dot_dimension_numbers<[1], [1], [0], [0], [0, 0, 1, 0], [], []>} : vector<16x16xf32>, vector<16x16xf32>, vector<16x16xf32> -> vector<16x16xf32>
    %cst_15 = arith.constant dense<0xFF800000> : vector<16xf32>
    %34 = vector.multi_reduction <maximumf>, %33, %cst_15 [1] : vector<16x16xf32> to vector<16xf32>
    %35 = vector.shape_cast %34 : vector<16xf32> to vector<16x1xf32>
    %36 = vector.broadcast %35 : vector<16x1xf32> to vector<16x16xf32>
    %37 = arith.subf %33, %36 : vector<16x16xf32>
    %38 = math.exp %37 : vector<16x16xf32>
    %cst_16 = arith.constant dense<0.000000e+00> : vector<16xf32>
    %39 = vector.multi_reduction <add>, %38, %cst_16 [1] : vector<16x16xf32> to vector<16xf32>
    %40 = vector.shape_cast %39 : vector<16xf32> to vector<16x1xf32>
    %41 = tpu.reciprocal %40 {approx = true} : vector<16x1xf32> -> vector<16x1xf32>
    %42 = vector.broadcast %41 : vector<16x1xf32> to vector<16x16xf32>
    %43 = arith.mulf %38, %42 : vector<16x16xf32>
    %cst_17 = arith.constant dense<0.000000e+00> : vector<16x16xf32>
    %44 = tpu.matmul %43, %32, %cst_17 {dimension_numbers = #tpu.dot_dimension_numbers<[1], [0], [0], [1], [0, 0, 1, 1], [], []>} : vector<16x16xf32>, vector<16x16xf32>, vector<16x16xf32> -> vector<16x16xf32>
    %45 = vector.extract_strided_slice %26 {offsets = [0, 16], sizes = [16, 16], strides = [1, 1]} : vector<16x64xf32> to vector<16x16xf32>
    %cst_18 = arith.constant 2.500000e-01 : f32
    %46 = vector.broadcast %cst_18 : f32 to vector<16x16xf32>
    %47 = arith.mulf %45, %46 : vector<16x16xf32>
    %48 = vector.extract_strided_slice %27 {offsets = [0, 16], sizes = [16, 16], strides = [1, 1]} : vector<16x128xf32> to vector<16x16xf32>
    %49 = vector.extract_strided_slice %27 {offsets = [0, 80], sizes = [16, 16], strides = [1, 1]} : vector<16x128xf32> to vector<16x16xf32>
    %cst_19 = arith.constant dense<0.000000e+00> : vector<16x16xf32>
    %50 = tpu.matmul %47, %48, %cst_19 {dimension_numbers = #tpu.dot_dimension_numbers<[1], [1], [0], [0], [0, 0, 1, 0], [], []>} : vector<16x16xf32>, vector<16x16xf32>, vector<16x16xf32> -> vector<16x16xf32>
    %cst_20 = arith.constant dense<0xFF800000> : vector<16xf32>
    %51 = vector.multi_reduction <maximumf>, %50, %cst_20 [1] : vector<16x16xf32> to vector<16xf32>
    %52 = vector.shape_cast %51 : vector<16xf32> to vector<16x1xf32>
    %53 = vector.broadcast %52 : vector<16x1xf32> to vector<16x16xf32>
    %54 = arith.subf %50, %53 : vector<16x16xf32>
    %55 = math.exp %54 : vector<16x16xf32>
    %cst_21 = arith.constant dense<0.000000e+00> : vector<16xf32>
    %56 = vector.multi_reduction <add>, %55, %cst_21 [1] : vector<16x16xf32> to vector<16xf32>
    %57 = vector.shape_cast %56 : vector<16xf32> to vector<16x1xf32>
    %58 = tpu.reciprocal %57 {approx = true} : vector<16x1xf32> -> vector<16x1xf32>
    %59 = vector.broadcast %58 : vector<16x1xf32> to vector<16x16xf32>
    %60 = arith.mulf %55, %59 : vector<16x16xf32>
    %cst_22 = arith.constant dense<0.000000e+00> : vector<16x16xf32>
    %61 = tpu.matmul %60, %49, %cst_22 {dimension_numbers = #tpu.dot_dimension_numbers<[1], [0], [0], [1], [0, 0, 1, 1], [], []>} : vector<16x16xf32>, vector<16x16xf32>, vector<16x16xf32> -> vector<16x16xf32>
    %62 = vector.extract_strided_slice %26 {offsets = [0, 32], sizes = [16, 16], strides = [1, 1]} : vector<16x64xf32> to vector<16x16xf32>
    %cst_23 = arith.constant 2.500000e-01 : f32
    %63 = vector.broadcast %cst_23 : f32 to vector<16x16xf32>
    %64 = arith.mulf %62, %63 : vector<16x16xf32>
    %65 = vector.extract_strided_slice %27 {offsets = [0, 32], sizes = [16, 16], strides = [1, 1]} : vector<16x128xf32> to vector<16x16xf32>
    %66 = vector.extract_strided_slice %27 {offsets = [0, 96], sizes = [16, 16], strides = [1, 1]} : vector<16x128xf32> to vector<16x16xf32>
    %cst_24 = arith.constant dense<0.000000e+00> : vector<16x16xf32>
    %67 = tpu.matmul %64, %65, %cst_24 {dimension_numbers = #tpu.dot_dimension_numbers<[1], [1], [0], [0], [0, 0, 1, 0], [], []>} : vector<16x16xf32>, vector<16x16xf32>, vector<16x16xf32> -> vector<16x16xf32>
    %cst_25 = arith.constant dense<0xFF800000> : vector<16xf32>
    %68 = vector.multi_reduction <maximumf>, %67, %cst_25 [1] : vector<16x16xf32> to vector<16xf32>
    %69 = vector.shape_cast %68 : vector<16xf32> to vector<16x1xf32>
    %70 = vector.broadcast %69 : vector<16x1xf32> to vector<16x16xf32>
    %71 = arith.subf %67, %70 : vector<16x16xf32>
    %72 = math.exp %71 : vector<16x16xf32>
    %cst_26 = arith.constant dense<0.000000e+00> : vector<16xf32>
    %73 = vector.multi_reduction <add>, %72, %cst_26 [1] : vector<16x16xf32> to vector<16xf32>
    %74 = vector.shape_cast %73 : vector<16xf32> to vector<16x1xf32>
    %75 = tpu.reciprocal %74 {approx = true} : vector<16x1xf32> -> vector<16x1xf32>
    %76 = vector.broadcast %75 : vector<16x1xf32> to vector<16x16xf32>
    %77 = arith.mulf %72, %76 : vector<16x16xf32>
    %cst_27 = arith.constant dense<0.000000e+00> : vector<16x16xf32>
    %78 = tpu.matmul %77, %66, %cst_27 {dimension_numbers = #tpu.dot_dimension_numbers<[1], [0], [0], [1], [0, 0, 1, 1], [], []>} : vector<16x16xf32>, vector<16x16xf32>, vector<16x16xf32> -> vector<16x16xf32>
    %79 = vector.extract_strided_slice %26 {offsets = [0, 48], sizes = [16, 16], strides = [1, 1]} : vector<16x64xf32> to vector<16x16xf32>
    %cst_28 = arith.constant 2.500000e-01 : f32
    %80 = vector.broadcast %cst_28 : f32 to vector<16x16xf32>
    %81 = arith.mulf %79, %80 : vector<16x16xf32>
    %82 = vector.extract_strided_slice %27 {offsets = [0, 48], sizes = [16, 16], strides = [1, 1]} : vector<16x128xf32> to vector<16x16xf32>
    %83 = vector.extract_strided_slice %27 {offsets = [0, 112], sizes = [16, 16], strides = [1, 1]} : vector<16x128xf32> to vector<16x16xf32>
    %cst_29 = arith.constant dense<0.000000e+00> : vector<16x16xf32>
    %84 = tpu.matmul %81, %82, %cst_29 {dimension_numbers = #tpu.dot_dimension_numbers<[1], [1], [0], [0], [0, 0, 1, 0], [], []>} : vector<16x16xf32>, vector<16x16xf32>, vector<16x16xf32> -> vector<16x16xf32>
    %cst_30 = arith.constant dense<0xFF800000> : vector<16xf32>
    %85 = vector.multi_reduction <maximumf>, %84, %cst_30 [1] : vector<16x16xf32> to vector<16xf32>
    %86 = vector.shape_cast %85 : vector<16xf32> to vector<16x1xf32>
    %87 = vector.broadcast %86 : vector<16x1xf32> to vector<16x16xf32>
    %88 = arith.subf %84, %87 : vector<16x16xf32>
    %89 = math.exp %88 : vector<16x16xf32>
    %cst_31 = arith.constant dense<0.000000e+00> : vector<16xf32>
    %90 = vector.multi_reduction <add>, %89, %cst_31 [1] : vector<16x16xf32> to vector<16xf32>
    %91 = vector.shape_cast %90 : vector<16xf32> to vector<16x1xf32>
    %92 = tpu.reciprocal %91 {approx = true} : vector<16x1xf32> -> vector<16x1xf32>
    %93 = vector.broadcast %92 : vector<16x1xf32> to vector<16x16xf32>
    %94 = arith.mulf %89, %93 : vector<16x16xf32>
    %cst_32 = arith.constant dense<0.000000e+00> : vector<16x16xf32>
    %95 = tpu.matmul %94, %83, %cst_32 {dimension_numbers = #tpu.dot_dimension_numbers<[1], [0], [0], [1], [0, 0, 1, 1], [], []>} : vector<16x16xf32>, vector<16x16xf32>, vector<16x16xf32> -> vector<16x16xf32>
    %96 = tpu.concatenate %44, %61, %78, %95 in 1 : vector<16x16xf32>, vector<16x16xf32>, vector<16x16xf32>, vector<16x16xf32> -> vector<16x64xf32>
    %c0_33 = arith.constant 0 : index
    %c0_34 = arith.constant 0 : index
    %97 = vector.load %arg5[%c0_33, %c0_34] : memref<64x64xf32, #tpu.memory_space<vmem>>, vector<64x64xf32>
    %cst_35 = arith.constant dense<0.000000e+00> : vector<16x64xf32>
    %98 = tpu.matmul %96, %97, %cst_35 {dimension_numbers = #tpu.dot_dimension_numbers<[1], [0], [0], [1], [0, 0, 1, 1], [], []>} : vector<16x64xf32>, vector<64x64xf32>, vector<16x64xf32> -> vector<16x64xf32>
    %c0_36 = arith.constant 0 : index
    %c0_37 = arith.constant 0 : index
    %99 = vector.load %arg6[%c0_36, %c0_37] : memref<1x64xf32, #tpu.memory_space<vmem>>, vector<1x64xf32>
    %100 = vector.broadcast %99 : vector<1x64xf32> to vector<16x64xf32>
    %101 = arith.addf %98, %100 : vector<16x64xf32>
    %c0_38 = arith.constant 0 : index
    %c0_39 = arith.constant 0 : index
    %c0_40 = arith.constant 0 : index
    %102 = vector.load %arg7[%c0_38, %c0_39, %c0_40] : memref<1x16x64xf32, #tpu.memory_space<vmem>>, vector<1x16x64xf32>
    %103 = vector.shape_cast %102 : vector<1x16x64xf32> to vector<16x64xf32>
    %104 = vector.shape_cast %101 : vector<16x64xf32> to vector<1x16x64xf32>
    tpu.vector_store %arg7[%c0_38, %c0_39, %c0_40], %104 {strides = array<i32>} : memref<1x16x64xf32, #tpu.memory_space<vmem>>, vector<1x16x64xf32>,
    return
  }
  func.func @transform_0(%arg0: i32) -> (i32, i32, i32) {
    %c0_i32 = arith.constant 0 : i32
    %c0_i32_0 = arith.constant 0 : i32
    %c0_i32_1 = arith.constant 0 : i32
    return %arg0, %c0_i32, %c0_i32_0 : i32, i32, i32
  }
  func.func @transform_1(%arg0: i32) -> (i32, i32) {
    %c0_i32 = arith.constant 0 : i32
    %c0_i32_0 = arith.constant 0 : i32
    %c0_i32_1 = arith.constant 0 : i32
    return %c0_i32, %c0_i32_0 : i32, i32
  }
  func.func @transform_2(%arg0: i32) -> (i32, i32) {
    %c0_i32 = arith.constant 0 : i32
    %c0_i32_0 = arith.constant 0 : i32
    %c0_i32_1 = arith.constant 0 : i32
    return %c0_i32, %c0_i32_0 : i32, i32
  }
  func.func @transform_3(%arg0: i32) -> (i32, i32) {
    %c0_i32 = arith.constant 0 : i32
    %c0_i32_0 = arith.constant 0 : i32
    %c0_i32_1 = arith.constant 0 : i32
    return %c0_i32, %c0_i32_0 : i32, i32
  }
  func.func @transform_4(%arg0: i32) -> (i32, i32) {
    %c0_i32 = arith.constant 0 : i32
    %c0_i32_0 = arith.constant 0 : i32
    %c0_i32_1 = arith.constant 0 : i32
    return %c0_i32, %c0_i32_0 : i32, i32
  }
  func.func @transform_5(%arg0: i32) -> (i32, i32) {
    %c0_i32 = arith.constant 0 : i32
    %c0_i32_0 = arith.constant 0 : i32
    %c0_i32_1 = arith.constant 0 : i32
    return %c0_i32, %c0_i32_0 : i32, i32
  }
  func.func @transform_6(%arg0: i32) -> (i32, i32, i32) {
    %c0_i32 = arith.constant 0 : i32
    %c0_i32_0 = arith.constant 0 : i32
    %c0_i32_1 = arith.constant 0 : i32
    return %arg0, %c0_i32, %c0_i32_0 : i32, i32, i32
  }
}

</mosaic_0001>

<bundles_post_ra>
// kernel: prenorm_self_attention.1
= control target key start
LH: loop header
LB: loop body
LE: loop exit
PB: predicated region body
PF: predicated region fallthrough
CT: control target
= control target key end

     0   :  { %11 = vsyncpa [#allocation3], 0  ;;  %s2450_s0 = inlined_call_operand.hbm [shape: f32[2,16,64], index: 0, kind: input, shape index: {}]   ;;  %s2451_s1 = inlined_call_operand.vmem [shape: f32[1,64], index: 1, kind: input, shape index: {}]   ;;  %s2452_s2 = inlined_call_operand.vmem [shape: f32[1,64], index: 2, kind: input, shape index: {}]   ;;  %s2453_s3 = inlined_call_operand.hbm [shape: f32[64,192], index: 3, kind: input, shape index: {}]   ;;  %s2454_s4 = inlined_call_operand.hbm [shape: f32[64,64], index: 4, kind: input, shape index: {}]   ;;  %s2455_s5 = inlined_call_operand.vmem [shape: f32[1,64], index: 5, kind: input, shape index: {}]   ;;  %s2456_s6 = inlined_call_operand.hbm [shape: f32[2,16,64], index: 6, kind: output, shape index: {}]  }
   0x1   :  { %13 = vsyncpa [#allocation3 + $0x1], 0 }
   0x2   :  { %14 = vsyncpa [#allocation6], 0 }
   0x3   :  { %15 = vsyncpa [#allocation4], 0 }
   0x4   :  { %17 = vsyncpa [#allocation4 + $0x1], 0  ;;  %s2084_s21 = smov 0   ;;  %s2086_s22 = smov 0  }
   0x5   :  { %s2088_s23 = smov 0   ;;  %s2090_s24 = smov 0  }
   0x6 LB: > { %s2105_s25 = sadd.s32 4294967295, %s2029_s24   ;;  %s1481_s26 = sadd.s32 4294967294, %s2029_s24   ;;  %s2029_s24 = sphi %s2090_s24, %s2478_s24   ;;  %s2025_s23 = sphi %s2088_s23, %s2477_s23   ;;  %s2021_s22 = sphi %s2086_s22, %s2476_s22   ;;  %s2017_s21 = sphi %s2084_s21, %s2475_s21  }
   0x7   : > { %p43_p0 = scmp.ne.s32.totalorder %s2021_s22, %s2017_s21  ;;  %p2457_p1 = scmp.eq.s32.totalorder %s2105_s25, 0 }
   0x8   : > { %p178_p3 = scmp.eq.s32.totalorder %s1481_s26, 1  ;;  %p1482_p5 = scmp.ge.s32.totalorder %s2029_s24, 1 }
   0x9   : > { %p2114_p4 = por %p2457_p1, %p43_p0  ;;  %p185_p7 = scmp.lt.s32.totalorder %s2029_s24, 3 }
   0xa   : > { %p2119_p6 = por %p178_p3, %p43_p0  ;;  %s2031_s30 = smov [#allocation5]  }
   0xb   : > { %s2460_s27 = scalar_select %p2114_p4, 1, 0 }
   0xc   : > { %s2461_s28 = scalar_select %p2119_p6, 1, 0 }
   0xd   : > { %p2124_p8 = pnand %p1482_p5, %p185_p7  ;;  %s203_s7 = sshll.u32 %s2031_s30, 4  ;;  %s2128_s7 = int_to_ptr.vmem [resolvable:$true] %s203_s7 }
   0xe   : > { %s2032_s9 = smov [#allocation7]   ;;  %s1873_s13 = scalar_lea.hbm %s2453_s3, 2048 }
   0xf   : > { %p1733_p9 = pneg %p2124_p8  ;;  %s216_s10 = sshll.u32 %s2032_s9, 4  ;;  %s2139_s10 = int_to_ptr.vmem [resolvable:$true] %s216_s10 }
  0x10   : > { %p1874_p12 = scmp.ne.s32.totalorder %s2453_s3, %s1873_s13  ;;  %p1880_p5 = scmp.lt.u32.totalorder %s1873_s13, %s2453_s3 }
  0x11   : > { %p2135_p11 = pnand %p1733_p9, %p2457_p1 }
  0x13   : > { %p1875_p13 = pneg %p2135_p11 }
  0x15   : > { %p1876_p0 = pnand %p1875_p13, %p1874_p12 }
  0x17   : > { %p1877_p3 = pneg %p1876_p0 }
  0x19   : > { %p1882_p7 = pnand %p1880_p5, %p1877_p3 }
  0x1b   : > { %1885 = shalt.err (!%p1882_p7)
}
  0x1c   : > { %s1886_s18 = scalar_lea.vmem %s2128_s7, 2048  ;;  %p1894_p2 = scmp.lt.s32.totalorder %s2128_s7, %s2128_s7 }
  0x1d   : > { %p1887_p9 = scmp.ne.s32.totalorder %s2128_s7, %s1886_s18  ;;  %p1895_p12 = scmp.lt.s32.totalorder %s1886_s18, %s1886_s18 }
  0x1f   : > { %p1889_p10 = pnand %p1887_p9, %p1875_p13  ;;  %p1896_p0 = por %p1895_p12, %p1894_p2 }
  0x21   : > { %p1890_p1 = pneg %p1889_p10 }
  0x23   : > { %p1897_p6 = pnand %p1896_p0, %p1890_p1 }
  0x25   : > { %1900 = shalt.err (!%p1897_p6)
}
  0x26   : > { %s2033_s19 = smov 256   ;;  %s2034_s20 = smov 16  }
  0x27   : > { %1736 = dma.hbm_to_vmem [thread:$0]  (!%p2135_p11), %s2453_s3, 2048, %s2128_s7, [#allocation6], %s2033_s19, %s2033_s19, %s2034_s20  }
  0x28   : > { %s1901_s12 = scalar_lea.hbm %s2454_s4, 1024 }
  0x29   : > { %p1902_p2 = scmp.ne.s32.totalorder %s2454_s4, %s1901_s12  ;;  %p1908_p10 = scmp.lt.u32.totalorder %s1901_s12, %s2454_s4 }
  0x2b   : > { %p1904_p1 = pnand %p1902_p2, %p1875_p13 }
  0x2d   : > { %p1905_p6 = pneg %p1904_p1 }
  0x2f   : > { %p1910_p3 = pnand %p1908_p10, %p1905_p6 }
  0x31   : > { %1913 = shalt.err (!%p1910_p3)
}
  0x32   : > { %s1914_s7 = scalar_lea.vmem %s2139_s10, 1024  ;;  %p1922_p12 = scmp.lt.s32.totalorder %s2139_s10, %s2139_s10 }
  0x33   : > { %p1915_p5 = scmp.ne.s32.totalorder %s2139_s10, %s1914_s7  ;;  %p1923_p0 = scmp.lt.s32.totalorder %s1914_s7, %s1914_s7 }
  0x35   : > { %p1917_p7 = pnand %p1915_p5, %p1875_p13  ;;  %p1924_p2 = por %p1923_p0, %p1922_p12 }
  0x37   : > { %p1918_p9 = pneg %p1917_p7 }
  0x39   : > { %p1925_p1 = pnand %p1924_p2, %p1918_p9 }
  0x3b   : > { %1928 = shalt.err (!%p1925_p1)
}
  0x3c   : > { %s2035_s17 = smov 128   ;;  %s2036_s18 = smov 8  }
  0x3d   : > { %1739 = dma.hbm_to_vmem [thread:$0]  (!%p2135_p11), %s2454_s4, 1024, %s2139_s10, [#allocation6], %s2035_s17, %s2035_s17, %s2036_s18  }
  0x3e   : > { %s2197_s26 = sadd.s32 1, %s2029_s24   ;;  %s30_s9 = sadd.s32 1, %s2025_s23 }
  0x3f   : > { %s27_s30 = ssub.s32 %s2029_s24, %s2197_s26  ;;  %p37_p6 = scmp.ne.s32.totalorder %s2025_s23, %s2021_s22 }
  0x40   : > { %p28_p13 = scmp.eq.s32.totalorder %s27_s30, 0  ;;  %p38_p10 = scmp.eq.s32.totalorder %s2029_s24, 0 }
  0x41   : > { %p2464_p5 = scmp.eq.s32.totalorder %s2105_s25, 1  ;;  %p1750_p9 = scmp.lt.s32.totalorder %s2029_s24, 2 }
  0x42   : > { %s2206_s11 = scalar_select %p28_p13, %s2025_s23, %s30_s9  }
  0x43   : > { %p39_p3 = por %p38_p10, %p37_p6  ;;  %p2210_p7 = por %p2464_p5, %p37_p6 }
  0x44   : > { %s233_s12 = sand.u32 1, %s2025_s23   ;;  %s1530_s10 = sshll.u32 %s2029_s24, 8 }
  0x45   : > { %s2465_s8 = scalar_select %p2210_p7, 1, 0 }
  0x46   : > { %s1486_s13 = sshll.u32 %s233_s12, 4  ;;  %s2220_s16 = scalar_lea.hbm %s2450_s0, %s1530_s10 }
  0x47   : > { %s237_s7 = scalar_lea.vmem [#allocation2], %s1486_s13  ;;  %p2224_p11 = pnand %p1750_p9, %p39_p3 }
  0x48   : > { %s244_s19 = sshll.u32 %s237_s7, 4  ;;  %s2228_s30 = scalar_lea.sflag [#allocation3], %s233_s12  ;;  %s2222_s19 = int_to_ptr.vmem [resolvable:$true] %s244_s19 }
  0x49   : > { %s1929_s9 = scalar_lea.hbm %s2220_s16, 256  ;;  %p1931_p0 = pneg %p2224_p11 }
  0x4a   : > { %p1930_p12 = scmp.ne.s32.totalorder %s2220_s16, %s1929_s9  ;;  %s1934_s14 = scalar_lea.hbm %s2450_s0, 512 }
  0x4b   : > { %p1935_p13 = scmp.lt.u32.totalorder %s2220_s16, %s2450_s0  ;;  %p1936_p6 = scmp.lt.u32.totalorder %s1934_s14, %s1929_s9 }
  0x4c   : > { %p1932_p2 = pnand %p1931_p0, %p1930_p12  ;;  %p1938_p3 = scmp.lt.u32.totalorder %s1929_s9, %s2220_s16 }
  0x4d   : > { %p1937_p10 = por %p1936_p6, %p1935_p13 }
  0x4e   : > { %p1933_p1 = pneg %p1932_p2 }
  0x4f   : > { %p1939_p5 = por %p1938_p3, %p1937_p10 }
  0x51   : > { %p1940_p9 = pnand %p1939_p5, %p1933_p1 }
  0x53   : > { %1943 = shalt.err (!%p1940_p9)
}
  0x54   : > { %s1944_s12 = scalar_lea.vmem %s2222_s19, 256  ;;  %s2037_s13 = smov [#allocation2]  }
  0x55   : > { %p1945_p12 = scmp.ne.s32.totalorder %s2222_s19, %s1944_s12  ;;  %s1949_s10 = sshll.u32 %s2037_s13, 4  ;;  %s1950_s10 = int_to_ptr.vmem [resolvable:$false] %s1949_s10 }
  0x56   : > { %s1951_s15 = scalar_lea.vmem %s1950_s10, 512  ;;  %p1952_p4 = scmp.lt.s32.totalorder %s2222_s19, %s1950_s10 }
  0x57   : > { %p1947_p2 = pnand %p1945_p12, %p1931_p0  ;;  %p1953_p13 = scmp.lt.s32.totalorder %s1951_s15, %s1944_s12 }
  0x59   : > { %p1948_p7 = pneg %p1947_p2  ;;  %p1954_p6 = por %p1953_p13, %p1952_p4 }
  0x5b   : > { %p1955_p10 = pnand %p1954_p6, %p1948_p7 }
  0x5d   : > { %1958 = shalt.err (!%p1955_p10)
}
  0x5e   : > { %1743 = dma.hbm_to_vmem [thread:$0]  (!%p2224_p11), %s2220_s16, 256, %s2222_s19, %s2228_s30, %s2035_s17, %s2035_s17, %s2036_s18  }
  0x5f   : > { %256 = sbr.rel (%p2124_p8) target bundleno = 2993 (0xbb1), region = 44  ;;  %s2262_s9 = sand.u32 (!%p2124_p8), 1, %s2021_s22  }
  0x60   : > { %s1490_s14 = sshll.u32 (!%p2124_p8), %s2262_s9, 4  ;;  %s259_s7 = scalar_lea.sflag (!%p2124_p8), [#allocation3], %s2262_s9 }
  0x61   : > { %s262_s20 = scalar_lea.vmem (!%p2124_p8), [#allocation2], %s1490_s14  ;;  %p2467_p4 = scmp.ne.s32.totalorder (!%p2124_p8), %s2460_s27, 0 }
  0x66   : > { %2004 = dma.done.wait (%p2467_p4), %s259_s7, 256  }
  0x67   : > { %2006 = vsyncadd (%p2467_p4), %s259_s7, 4294967040  ;;  %p2468_p7 = scmp.eq.s32.totalorder %s2105_s25, 0 }
  0x69   : > { %2008 = dma.done.wait (%p2468_p7), [#allocation6], 3072   ;;  %p2469_p8 = pmov %p2468_p7 }
  0x6a   : > { %vm303_vm0 = vcmask 523264   ;;  %v299_v0 = vld [vmem:[%s262_s20] sm:$0xff]  ;;  %v300_v1 = vld [vmem:[%s262_s20 + $0x8] sm:$0xff]  ;;  %v2038_v33 = vmov 0.0   ;;  %vm454_vm1 = vcmask 130048   ;;  %s2039_s16 = smov 64  }
  0x6b   : > { %2010 = vsyncadd (%p2469_p8), [#allocation6], 4294964224  ;;  %v304_v2 = vsel %vm303_vm0, %v299_v0, 0.0  ;;  %v307_v3 = vsel %vm303_vm0, %v300_v1, 0.0  ;;  %v348_v14 = vld [vmem:[#allocation5 + $0x8] sm:$0xff]  ;;  %v350_v15 = vld [vmem:[#allocation5 + $0x18] sm:$0xff]  ;;  %433 = vmatprep.mubr.f32.mxu0 %v2038_v33 }
  0x6c   : > { %305 = vadd.xlane.f32.xlu0 %v304_v2  ;;  %v1649_v16 = vpack.c.bf16 %v350_v15, %v348_v14  ;;  %v347_v17 = vld [vmem:[#allocation5] sm:$0xff]  ;;  %v349_v18 = vld [vmem:[#allocation5 + $0x10] sm:$0xff]  ;;  %v352_v20 = vld [vmem:[#allocation5 + $0x28] sm:$0xff]  ;;  %s2040_s19 = smov 112   ;;  %s2041_s30 = smov 32   ;;  %vm1271_vm3 = vcmask 261120  }
  0x6d   : > { %v1651_v19 = vpack.c.bf16 %v349_v18, %v347_v17  ;;  %v354_v21 = vld [vmem:[#allocation5 + $0x38] sm:$0xff]  ;;  %v351_v23 = vld [vmem:[#allocation5 + $0x20] sm:$0xff]  ;;  %v353_v24 = vld [vmem:[#allocation5 + $0x30] sm:$0xff]  ;;  %s2042_s12 = smov 96   ;;  %s2043_s13 = smov 48   ;;  %vm1274_vm4 = vcmask 392192  }
  0x6e   : > { %1650 = vmatprep.subr.bf16.mxu0 %v1649_v16  ;;  %v1653_v22 = vpack.c.bf16 %v354_v21, %v352_v20  ;;  %v1655_v25 = vpack.c.bf16 %v353_v24, %v351_v23  ;;  %v356_v26 = vld [vmem:[#allocation5 + $0x48] sm:$0xff]  ;;  %v358_v27 = vld [vmem:[#allocation5 + $0x58] sm:$0xff]  ;;  %v355_v28 = vld [vmem:[#allocation5 + $0x40] sm:$0xff]  ;;  %s2044_s10 = smov 16   ;;  %s2045_s15 = smov 80  }
  0x6f   : > { %1652 = vmatpush1.bf16.msra.mxu0 %v1651_v19  ;;  %v1657_v29 = vpack.c.bf16 %v358_v27, %v356_v26  ;;  %v357_v30 = vld [vmem:[#allocation5 + $0x50] sm:$0xff]  ;;  %v360_v31 = vld [vmem:[#allocation5 + $0x68] sm:$0xff]  ;;  %v362_v32 = vld [vmem:[#allocation5 + $0x78] sm:$0xff]  ;;  %s298_s7 = scalar_lea.vmem [#allocation8], %s1490_s14  ;;  %s1531_s17 = sshll.u32 %s2105_s25, 8 }
  0x70   : > { %308 = vadd.xlane.f32.xlu0 %v307_v3  ;;  %1654 = vmatprep.subr.bf16.mxu0 %v1653_v22  ;;  %v1659_v34 = vpack.c.bf16 %v357_v30, %v355_v28  ;;  %v1661_v35 = vpack.c.bf16 %v362_v32, %v360_v31  ;;  %v359_v36 = vld [vmem:[#allocation5 + $0x60] sm:$0xff]  ;;  %v361_v37 = vld [vmem:[#allocation5 + $0x70] sm:$0xff]  ;;  %vm2309_vm2 = vmpackc.low %vm454_vm1, %vm454_vm1  ;;  %s1389_s20 = sshll.u32 %s298_s7, 4  ;;  %s1376_s14 = scalar_lea.sflag [#allocation4], %s2262_s9  ;;  %s2399_s20 = int_to_ptr.vmem [resolvable:$true] %s1389_s20 }
  0x71   : > { %v1663_v38 = vpack.c.bf16 %v361_v37, %v359_v36  ;;  %v1494_v46 = vld [vmem:[%s2451_s1] ss:$0 sm:$0xff]  ;;  %s1959_s25 = scalar_lea.vmem %s2399_s20, 256  ;;  %p2472_p0 = scmp.ne.s32.totalorder %s2465_s8, 0 }
  0x72   : > { %v1495_v48 = vld [vmem:[%s2452_s2] ss:$0 sm:$0xff]  ;;  %p1960_p11 = scmp.ne.s32.totalorder %s2399_s20, %s1959_s25 }
  0x73   : > { %1656 = vmatpush1.bf16.msra.mxu0 %v1655_v25 }
  0x74   : > { %1658 = vmatprep.subr.bf16.mxu0 %v1657_v29  ;;  %p1961_p1 = pnand %p1960_p11, %p2472_p0 }
  0x76   : > { %p1962_p3 = pneg %p1961_p1 }
  0x77   : > { %1660 = vmatpush1.bf16.msra.mxu0 %v1659_v34 }
  0x78   : > { %1662 = vmatprep.subr.bf16.mxu0 %v1661_v35 }
  0x7b   : > { %1664 = vmatpush1.bf16.msra.mxu0 %v1663_v38 }
  0xf9   : > { %v306_v4 = vpop.xlane.xlu0 %305 }
  0xfa   : > { %v311_v5 = vmul.f32 0.015625, %v306_v4 }
  0xfc   : > { %v313_v6 = vsub.f32 %v299_v0, %v311_v5 }
  0xfd   : > { %v309_v7 = vpop.xlane.xlu0 %308 }
  0xfe   : > { %v312_v8 = vmul.f32 0.015625, %v309_v7  ;;  %v315_v9 = vmul.f32 %v313_v6, %v313_v6 }
 0x100   : > { %v314_v10 = vsub.f32 %v300_v1, %v312_v8  ;;  %v317_v11 = vsel %vm303_vm0, %v315_v9, 0.0 }
 0x101   : > { %318 = vadd.xlane.f32.xlu1 %v317_v11 }
 0x102   : > { %v316_v12 = vmul.f32 %v314_v10, %v314_v10 }
 0x104   : > { %v320_v13 = vsel %vm303_vm0, %v316_v12, 0.0 }
 0x105   : > { %321 = vadd.xlane.f32.xlu1 %v320_v13 }
 0x18e   : > { %v319_v39 = vpop.xlane.xlu1 %318 }
 0x18f   : > { %v323_v40 = vmul.f32 0.015625, %v319_v39 }
 0x191   : > { %v325_v41 = vadd.f32 1e-05, %v323_v40 }
 0x192   : > { %v322_v42 = vpop.xlane.xlu1 %321 }
 0x193   : > { %1837 = vrsqrt.f32 %v325_v41  ;;  %v324_v43 = vmul.f32 0.015625, %v322_v42 }
 0x195   : > { %v326_v44 = vadd.f32 1e-05, %v324_v43 }
 0x197   : > { %1839 = vrsqrt.f32 %v326_v44 }
 0x19d   : > { %v1838_v45 = vpop.eup %1837 }
 0x19e   : > { %v329_v47 = vmul.f32 %v1838_v45, %v313_v6 }
 0x1a0   : > { %v337_v49 = vmul.f32 %v1494_v46, %v329_v47 }
 0x1a1   : > { %v1840_v50 = vpop.eup %1839 }
 0x1a2   : > { %v345_v51 = vadd.f32 %v1495_v48, %v337_v49  ;;  %v330_v52 = vmul.f32 %v1840_v50, %v314_v10 }
 0x1a4   : > { %1496 = vmatmul.mubr.msk.f32.vlgmr.msra.gmra.mrb[0].mxu0 %vm303_vm0, %v345_v51  ;;  %v338_v53 = vmul.f32 %v1494_v46, %v330_v52 }
 0x1a5   : > { %439 = vmatprep.mubr.f32.mxu0 %v2038_v33 }
 0x1a6   : > { %v346_v54 = vadd.f32 %v1495_v48, %v338_v53 }
 0x1a8   : > { %1497 = vmatmul.mubr.msk.f32.gmra.mrb[2].mxu0 %vm303_vm0, %v346_v54 }
 0x277   : > { %v435_v55 = vpop.f32.mrb[0].mxu0 }
 0x278   : > { %v437_v56 = vpop.f32.mrb[1].mxu0  ;;  %v2288_v57 = vmul.f32 0.25, %v435_v55 }
 0x27a   : > { %1578 = vmatprep.mubr.msk.f32.mxu0 %vm454_vm1, %v2288_v57 }
 0x27b   : > { %v441_v58 = vpop.f32.mrb[2].mxu0 }
 0x27c   : > { %v443_v59 = vpop.f32.mrb[3].mxu0  ;;  %v2292_v60 = vpack.i.bf16 %v441_v58, %v435_v55  ;;  %v2301_v63 = vmul.f32 0.25, %v441_v58 }
 0x27d   : > { %v1671_v61 = vpack.c.bf16 %v443_v59, %v437_v56  ;;  %v2294_v62 = vpack.i.bf16 %v443_v59, %v437_v56 }
 0x27e   : > { %1803 = vrot.lane.b32.xlu0 %v2292_v60, %s2039_s16 }
 0x27f   : > { %1672 = vmatprep.subr.bf16.mxu1 %v1671_v61 }
 0x280   : > { %1674 = vmatpush3.bf16.msra.mxu1 %v1671_v61 }
 0x282   : > { %643 = vrot.lane.b32.xlu0 %v2288_v57, %s2040_s19 }
 0x286   : > { %1813 = vrot.lane.b32.xlu0 %v2292_v60, %s2041_s30 }
 0x28a   : > { %645 = vrot.lane.b32.xlu0 %v2301_v63, %s2040_s19 }
 0x28e   : > { %847 = vrot.lane.b32.xlu0 %v2301_v63, %s2042_s12 }
 0x2f0   : > { %v1804_v0 = vpop.permute.xlu0 %1803 }
 0x2f1   : > { %v1806_v1 = vunpack.i.h.bf16 %v1804_v0  ;;  %v1805_v2 = vunpack.i.l.bf16 %v1804_v0 }
 0x2f3   : > { %v1665_v4 = vpack.c.bf16 %v1806_v1, %v1805_v2 }
 0x2f4   : > { %v644_v21 = vpop.permute.xlu0 %643 }
 0x2f5   : > { %1667 = vmatprep.subr.msk.bf16.mxu0 %vm2309_vm2, %v1665_v4 }
 0x2f6   : > { %1670 = vmatpush3.bf16.xpose.msk.msra.mxu0 %vm2309_vm2, %v1665_v4 }
 0x2f8   : > { %v1814_v26 = vpop.permute.xlu0 %1813 }
 0x2f9   : > { %v1816_v29 = vunpack.i.h.bf16 %v1814_v26  ;;  %v1815_v30 = vunpack.i.l.bf16 %v1814_v26 }
 0x2fb   : > { %v1685_v33 = vpack.c.bf16 %v1816_v29, %v1815_v30 }
 0x2fc   : > { %v646_v34 = vpop.permute.xlu0 %645 }
 0x2fd   : > { %1579 = vmatmul.mubr.msk.f32.vlgmr.msra.gmra.mrb[4].mxu0 %vm454_vm1, %v2301_v63 }
 0x300   : > { %v848_v36 = vpop.permute.xlu0 %847 }
 0x3d0   : > { %v1580_v5 = vpop.f32.mrb[4].mxu0 }
 0x3d1   : > { %v531_v6 = vpop.f32.mrb[5].mxu0  ;;  %v543_v8 = vsel %vm454_vm1, %v1580_v5, -inf }
 0x3d2   : > { %v540_v7 = vsel %vm454_vm1, %v531_v6, -inf }
 0x3d3   : > { %541 = vmax.xlane.f32.xlu1 %v540_v7 }
 0x3d7   : > { %544 = vmax.xlane.f32.xlu1 %v543_v8 }
 0x460   : > { %v542_v9 = vpop.xlane.xlu1 %541 }
 0x461   : > { %v546_v10 = vsub.f32 %v531_v6, %v542_v9 }
 0x463   : > { %v548_v13 = vmul.f32 1.442695, %v546_v10 }
 0x464   : > { %v545_v11 = vpop.xlane.xlu1 %544 }
 0x465   : > { %v547_v12 = vsub.f32 %v1580_v5, %v545_v11 }
 0x467   : > { %v550_v14 = vmul.f32 1.442695, %v547_v12 }
 0x469   : > { %1841 = vpow2.f32 %v550_v14 }
 0x46a   : > { %1843 = vpow2.f32 %v548_v13 }
 0x473   : > { %v1842_v15 = vpop.eup %1841 }
 0x474   : > { %v555_v16 = vsel %vm454_vm1, %v1842_v15, 0.0  ;;  %v1844_v17 = vpop.eup %1843 }
 0x475   : > { %556 = vadd.xlane.f32.xlu1 %v555_v16  ;;  %v552_v18 = vsel %vm454_vm1, %v1844_v17, 0.0 }
 0x479   : > { %553 = vadd.xlane.f32.xlu1 %v552_v18 }
 0x48a   : > { %1808 = vrot.lane.b32.xlu1 %v2292_v60, %s2043_s13 }
 0x48e   : > { %845 = vrot.lane.b32.xlu1 %v2288_v57, %s2042_s12 }
 0x502   : > { %v557_v19 = vpop.xlane.xlu1 %556 }
 0x503   : > { %1845 = vrcp.f32 %v557_v19 }
 0x506   : > { %v554_v20 = vpop.xlane.xlu1 %553 }
 0x507   : > { %1847 = vrcp.f32 %v554_v20 }
 0x50a   : > { %v1809_v22 = vpop.permute.xlu1 %1808 }
 0x50b   : > { %v1811_v23 = vunpack.i.h.bf16 %v1809_v22  ;;  %v1810_v24 = vunpack.i.l.bf16 %v1809_v22 }
 0x50d   : > { %v1675_v25 = vpack.c.bf16 %v1811_v23, %v1810_v24  ;;  %v1846_v27 = vpop.eup %1845 }
 0x50e   : > { %v561_v32 = vmul.f32 %v1846_v27, %v1842_v15  ;;  %v846_v35 = vpop.permute.xlu1 %845 }
 0x50f   : > { %1677 = vmatprep.subr.msk.bf16.mxu1 %vm2309_vm2, %v1675_v25 }
 0x511   : > { %v1848_v28 = vpop.eup %1847 }
 0x512   : > { %v560_v31 = vmul.f32 %v1848_v28, %v1844_v17 }
 0x514   : > { %1585 = vmatprep.mubr.msk.f32.mxu1 %vm454_vm1, %v560_v31 }
 0x515   : > { %1586 = vmatmul.mubr.msk.f32.vlgmr.msra.gmra.mrb[0].mxu1 %vm454_vm1, %v561_v32 }
 0x516   : > { %1680 = vmatpush3.bf16.xpose.msk.msra.mxu1 %vm2309_vm2, %v1675_v25  ;;  %1592 = vmatprep.mubr.msk.f32.mxu1 %vm454_vm1, %v644_v21 }
 0x517   : > { %1687 = vmatprep.subr.msk.bf16.mxu1 %vm2309_vm2, %v1685_v33 }
 0x51d   : > { %1593 = vmatmul.mubr.msk.f32.vlgmr.msra.gmra.mrb[2].mxu1 %vm454_vm1, %v646_v34 }
 0x51e   : > { %1690 = vmatpush3.bf16.xpose.msk.msra.mxu1 %vm2309_vm2, %v1685_v33  ;;  %1606 = vmatprep.mubr.msk.f32.mxu1 %vm454_vm1, %v846_v35 }
 0x525   : > { %1607 = vmatmul.mubr.msk.f32.vlgmr.msra.gmra.mrb[4].mxu1 %vm454_vm1, %v848_v36 }
 0x5e8   : > { %v2341_v37 = vpop.f32.mrb[0].mxu1 }
 0x5e9   : > { %v2343_v38 = vpop.f32.mrb[1].mxu1 }
 0x5f0   : > { %v1594_v39 = vpop.f32.mrb[2].mxu1 }
 0x5f1   : > { %v725_v40 = vpop.f32.mrb[3].mxu1  ;;  %v737_v41 = vsel %vm454_vm1, %v1594_v39, -inf }
 0x5f2   : > { %738 = vmax.xlane.f32.xlu0 %v737_v41  ;;  %v734_v42 = vsel %vm454_vm1, %v725_v40, -inf }
 0x5f3   : > { %735 = vmax.xlane.f32.xlu1 %v734_v42 }
 0x5f8   : > { %v1608_v43 = vpop.f32.mrb[4].mxu1 }
 0x5f9   : > { %v927_v44 = vpop.f32.mrb[5].mxu1  ;;  %v939_v46 = vsel %vm454_vm1, %v1608_v43, -inf }
 0x5fa   : > { %v936_v45 = vsel %vm454_vm1, %v927_v44, -inf }
 0x5fb   : > { %937 = vmax.xlane.f32.xlu0 %v936_v45 }
 0x5ff   : > { %940 = vmax.xlane.f32.xlu0 %v939_v46 }
 0x604   : > { %1818 = vrot.lane.b32.xlu1 %v2294_v62, %s2040_s19  ;;  %s2404_s19 = scalar_lea.hbm %s2456_s6, %s1531_s17 }
 0x67f   : > { %v739_v47 = vpop.xlane.xlu0 %738 }
 0x680   : > { %v741_v48 = vsub.f32 %v1594_v39, %v739_v47  ;;  %v736_v49 = vpop.xlane.xlu1 %735 }
 0x681   : > { %v740_v50 = vsub.f32 %v725_v40, %v736_v49 }
 0x682   : > { %v744_v51 = vmul.f32 1.442695, %v741_v48 }
 0x683   : > { %v742_v52 = vmul.f32 1.442695, %v740_v50 }
 0x684   : > { %1849 = vpow2.f32 %v744_v51  ;;  %v1819_v53 = vpop.permute.xlu1 %1818 }
 0x685   : > { %1851 = vpow2.f32 %v742_v52  ;;  %v1821_v54 = vunpack.i.h.bf16 %v1819_v53  ;;  %v1820_v55 = vunpack.i.l.bf16 %v1819_v53 }
 0x687   : > { %v1681_v56 = vpack.c.bf16 %v1821_v54, %v1820_v55 }
 0x688   : > { %v938_v58 = vpop.xlane.xlu0 %937 }
 0x689   : > { %1682 = vmatprep.subr.bf16.mxu0 %v1681_v56  ;;  %v942_v8 = vsub.f32 %v927_v44, %v938_v58 }
 0x68a   : > { %1684 = vmatpush3.bf16.msra.mxu0 %v1681_v56 }
 0x68b   : > { %v944_v9 = vmul.f32 1.442695, %v942_v8 }
 0x68c   : > { %v941_v59 = vpop.xlane.xlu0 %940 }
 0x68d   : > { %v943_v61 = vsub.f32 %v1608_v43, %v941_v59 }
 0x68e   : > { %v1850_v0 = vpop.eup %1849 }
 0x68f   : > { %v1852_v1 = vpop.eup %1851  ;;  %v946_v2 = vmul.f32 1.442695, %v943_v61  ;;  %v749_v4 = vsel %vm454_vm1, %v1850_v0, 0.0 }
 0x690   : > { %750 = vadd.xlane.f32.xlu0 %v749_v4  ;;  %v746_v5 = vsel %vm454_vm1, %v1852_v1, 0.0  ;;  %v1280_v4 = vld [vmem:[#allocation7 + $0x18] sm:$0xff] }
 0x691   : > { %1853 = vpow2.f32 %v946_v2  ;;  %747 = vadd.xlane.f32.xlu1 %v746_v5 }
 0x692   : > { %1855 = vpow2.f32 %v944_v9  ;;  %v1283_v9 = vld [vmem:[#allocation7 + $0x30] sm:$0xff] }
 0x69b   : > { %v1854_v6 = vpop.eup %1853 }
 0x69c   : > { %v951_v7 = vsel %vm454_vm1, %v1854_v6, 0.0  ;;  %v1856_v10 = vpop.eup %1855 }
 0x69d   : > { %952 = vadd.xlane.f32.xlu0 %v951_v7  ;;  %v948_v11 = vsel %vm454_vm1, %v1856_v10, 0.0  ;;  %v1282_v7 = vld [vmem:[#allocation7 + $0x28] sm:$0xff] }
 0x6a2   : > { %1828 = vrot.lane.b32.xlu1 %v2292_v60, %s2044_s10 }
 0x6a6   : > { %1045 = vrot.lane.b32.xlu1 %v2288_v57, %s2045_s15 }
 0x6b3   : > { %1823 = vrot.lane.b32.xlu0 %v2294_v62, %s2042_s12 }
 0x6ca   : > { %949 = vadd.xlane.f32.xlu1 %v948_v11 }
 0x6db   : > { %1047 = vrot.lane.b32.xlu1 %v2301_v63, %s2045_s15 }
 0x71d   : > { %v751_v12 = vpop.xlane.xlu0 %750 }
 0x71e   : > { %1857 = vrcp.f32 %v751_v12  ;;  %v748_v60 = vpop.xlane.xlu1 %747 }
 0x71f   : > { %1859 = vrcp.f32 %v748_v60 }
 0x722   : > { %v1829_v17 = vpop.permute.xlu1 %1828 }
 0x723   : > { %v1831_v19 = vunpack.i.h.bf16 %v1829_v17  ;;  %v1830_v20 = vunpack.i.l.bf16 %v1829_v17 }
 0x725   : > { %v1695_v23 = vpack.c.bf16 %v1831_v19, %v1830_v20 }
 0x726   : > { %v1046_v24 = vpop.permute.xlu1 %1045 }
 0x728   : > { %v1858_v13 = vpop.eup %1857 }
 0x729   : > { %v1860_v14 = vpop.eup %1859  ;;  %v755_v16 = vmul.f32 %v1858_v13, %v1850_v0  ;;  %v1278_v0 = vld [vmem:[#allocation7 + $0x8] sm:$0xff] }
 0x72a   : > { %v953_v57 = vpop.xlane.xlu0 %952  ;;  %v754_v15 = vmul.f32 %v1860_v14, %v1852_v1  ;;  %v1279_v1 = vld [vmem:[#allocation7 + $0x10] sm:$0xff] }
 0x72b   : > { %1861 = vrcp.f32 %v953_v57  ;;  %v1709_v5 = vpack.c.bf16 %v1280_v4, %v1279_v1 }
 0x72c   : > { %1599 = vmatprep.mubr.msk.f32.mxu0 %vm454_vm1, %v754_v15 }
 0x72d   : > { %1600 = vmatmul.mubr.msk.f32.vlgmr.msra.gmra.mrb[6].mxu0 %vm454_vm1, %v755_v16 }
 0x72e   : > { %v1824_v18 = vpop.permute.xlu0 %1823 }
 0x72f   : > { %v1826_v21 = vunpack.i.h.bf16 %v1824_v18  ;;  %v1825_v22 = vunpack.i.l.bf16 %v1824_v18 }
 0x731   : > { %v1691_v63 = vpack.c.bf16 %v1826_v21, %v1825_v22 }
 0x733   : > { %1692 = vmatprep.subr.bf16.mxu0 %v1691_v63 }
 0x734   : > { %1694 = vmatpush3.bf16.msra.mxu0 %v1691_v63 }
 0x735   : > { %1697 = vmatprep.subr.msk.bf16.mxu0 %vm2309_vm2, %v1695_v23  ;;  %v1862_v26 = vpop.eup %1861 }
 0x736   : > { %v957_v29 = vmul.f32 %v1862_v26, %v1854_v6  ;;  %v1281_v6 = vld [vmem:[#allocation7 + $0x20] sm:$0xff] }
 0x737   : > { %v1713_v8 = vpack.c.bf16 %v1282_v7, %v1281_v6 }
 0x757   : > { %v950_v25 = vpop.xlane.xlu1 %949 }
 0x758   : > { %1863 = vrcp.f32 %v950_v25 }
 0x75b   : > { %v1048_v30 = vpop.permute.xlu1 %1047 }
 0x762   : > { %v1864_v27 = vpop.eup %1863 }
 0x763   : > { %v956_v28 = vmul.f32 %v1864_v27, %v1856_v10  ;;  %v1284_v10 = vld [vmem:[#allocation7 + $0x38] sm:$0xff] }
 0x764   : > { %v1717_v11 = vpack.c.bf16 %v1284_v10, %v1283_v9 }
 0x765   : > { %1613 = vmatprep.mubr.msk.f32.mxu0 %vm454_vm1, %v956_v28 }
 0x766   : > { %1614 = vmatmul.mubr.msk.f32.vlgmr.msra.gmra.mrb[8].mxu0 %vm454_vm1, %v957_v29 }
 0x767   : > { %1700 = vmatpush3.bf16.xpose.msk.msra.mxu0 %vm2309_vm2, %v1695_v23  ;;  %1620 = vmatprep.mubr.msk.f32.mxu0 %vm454_vm1, %v1046_v24 }
 0x76e   : > { %1621 = vmatmul.mubr.msk.f32.vlgmr.msra.gmra.mrb[10].mxu0 %vm454_vm1, %v1048_v30 }
 0x800   : > { %v1601_v31 = vpop.f32.mrb[6].mxu0 }
 0x801   : > { %v836_v32 = vpop.f32.mrb[7].mxu0 }
 0x839   : > { %v1615_v33 = vpop.f32.mrb[8].mxu0 }
 0x83a   : > { %v1036_v34 = vpop.f32.mrb[9].mxu0 }
 0x841   : > { %v1622_v35 = vpop.f32.mrb[10].mxu0 }
 0x842   : > { %v1127_v36 = vpop.f32.mrb[11].mxu0  ;;  %v1139_v39 = vsel %vm454_vm1, %v1622_v35, -inf }
 0x843   : > { %1140 = vmax.xlane.f32.xlu1 %v1139_v39  ;;  %v1136_v40 = vsel %vm454_vm1, %v1127_v36, -inf }
 0x844   : > { %1137 = vmax.xlane.f32.xlu0 %v1136_v40 }
 0x854   : > { %1247 = vrot.lane.b32.xlu1 %v836_v32, %s2044_s10 }
 0x858   : > { %1249 = vrot.lane.b32.xlu1 %v1601_v31, %s2044_s10 }
 0x85c   : > { %1255 = vrot.lane.b32.xlu1 %v1036_v34, %s2041_s30 }
 0x8d0   : > { %v1141_v3 = vpop.xlane.xlu1 %1140 }
 0x8d1   : > { %v1143_v41 = vsub.f32 %v1622_v35, %v1141_v3  ;;  %v1138_v42 = vpop.xlane.xlu0 %1137 }
 0x8d2   : > { %v1142_v43 = vsub.f32 %v1127_v36, %v1138_v42 }
 0x8d3   : > { %v1146_v44 = vmul.f32 1.442695, %v1143_v41 }
 0x8d4   : > { %v1144_v45 = vmul.f32 1.442695, %v1142_v43  ;;  %v1248_v13 = vpop.permute.xlu1 %1247 }
 0x8d5   : > { %1865 = vpow2.f32 %v1146_v44  ;;  %v1269_v16 = vsel %vm454_vm1, %v2343_v38, %v1248_v13  ;;  %v1522_v38 = vld [vmem:[%s2455_s5] ss:$0 sm:$0xff] }
 0x8d6   : > { %1867 = vpow2.f32 %v1144_v45 }
 0x8d8   : > { %v1250_v14 = vpop.permute.xlu1 %1249 }
 0x8d9   : > { %v1270_v18 = vsel %vm454_vm1, %v2341_v37, %v1250_v14 }
 0x8dc   : > { %v1256_v15 = vpop.permute.xlu1 %1255 }
 0x8dd   : > { %v1272_v19 = vsel %vm1271_vm3, %v1269_v16, %v1256_v15 }
 0x8df   : > { %v1866_v46 = vpop.eup %1865 }
 0x8e0   : > { %v1151_v47 = vsel %vm454_vm1, %v1866_v46, 0.0  ;;  %v1868_v48 = vpop.eup %1867 }
 0x8e1   : > { %1152 = vadd.xlane.f32.xlu0 %v1151_v47  ;;  %v1148_v49 = vsel %vm454_vm1, %v1868_v48, 0.0 }
 0x8e5   : > { %1149 = vadd.xlane.f32.xlu0 %v1148_v49 }
 0x8fb   : > { %1833 = vrot.lane.b32.xlu0 %v2294_v62, %s2045_s15  ;;  %v1277_v62 = vld [vmem:[#allocation7] sm:$0xff] }
 0x8fc   : > { %v1705_v2 = vpack.c.bf16 %v1278_v0, %v1277_v62 }
 0x8ff   : > { %1257 = vrot.lane.b32.xlu0 %v1615_v33, %s2041_s30  ;;  %s2046_s30 = smov [#allocation8]  }
 0x900   : > { %s1963_s12 = sshll.u32 %s2046_s30, 4  ;;  %s1964_s12 = int_to_ptr.vmem [resolvable:$false] %s1963_s12 }
 0x901   : > { %p1966_p5 = scmp.lt.s32.totalorder %s2399_s20, %s1964_s12 }
 0x96e   : > { %v1153_v50 = vpop.xlane.xlu0 %1152 }
 0x96f   : > { %1869 = vrcp.f32 %v1153_v50 }
 0x972   : > { %v1150_v51 = vpop.xlane.xlu0 %1149 }
 0x973   : > { %1871 = vrcp.f32 %v1150_v51 }
 0x976   : > { %v1834_v52 = vpop.permute.xlu0 %1833 }
 0x977   : > { %v1836_v53 = vunpack.i.h.bf16 %v1834_v52  ;;  %v1835_v54 = vunpack.i.l.bf16 %v1834_v52 }
 0x979   : > { %v1701_v55 = vpack.c.bf16 %v1836_v53, %v1835_v54  ;;  %v1870_v56 = vpop.eup %1869 }
 0x97a   : > { %v1157_v61 = vmul.f32 %v1870_v56, %v1866_v46  ;;  %v1258_v57 = vpop.permute.xlu0 %1257 }
 0x97b   : > { %1702 = vmatprep.subr.bf16.mxu1 %v1701_v55  ;;  %v1273_v21 = vsel %vm1271_vm3, %v1270_v18, %v1258_v57 }
 0x97c   : > { %1704 = vmatpush3.bf16.msra.mxu1 %v1701_v55 }
 0x97d   : > { %v1872_v58 = vpop.eup %1871  ;;  %1706 = vmatprep.subr.bf16.mxu1 %v1705_v2 }
 0x97e   : > { %v1156_v59 = vmul.f32 %v1872_v58, %v1868_v48 }
 0x980   : > { %1627 = vmatprep.mubr.msk.f32.mxu1 %vm454_vm1, %v1156_v59 }
 0x981   : > { %1628 = vmatmul.mubr.msk.f32.vlgmr.msra.gmra.mrb[6].mxu1 %vm454_vm1, %v1157_v61 }
 0x982   : > { %1708 = vmatpush3.bf16.msra.mxu1 %v1705_v2 }
 0x983   : > { %1710 = vmatprep.subr.bf16.mxu1 %v1709_v5 }
 0x986   : > { %1712 = vmatpush3.bf16.msra.mxu1 %v1709_v5 }
 0x987   : > { %1714 = vmatprep.subr.bf16.mxu1 %v1713_v8 }
 0x98a   : > { %1716 = vmatpush3.bf16.msra.mxu1 %v1713_v8 }
 0x98b   : > { %1718 = vmatprep.subr.bf16.mxu1 %v1717_v11 }
 0x98e   : > { %1720 = vmatpush3.bf16.msra.mxu1 %v1717_v11 }
 0xa54   : > { %v1629_v12 = vpop.f32.mrb[6].mxu1 }
 0xa55   : > { %1265 = vrot.lane.b32.xlu0 %v1629_v12, %s2043_s13  ;;  %v1236_v60 = vpop.f32.mrb[7].mxu1 }
 0xa56   : > { %1263 = vrot.lane.b32.xlu1 %v1236_v60, %s2043_s13  ;;  %s1965_s13 = scalar_lea.vmem %s1964_s12, 512 }
 0xa57   : > { %p1967_p9 = scmp.lt.s32.totalorder %s1965_s13, %s1959_s25 }
 0xa59   : > { %p1968_p12 = por %p1967_p9, %p1966_p5 }
 0xa5b   : > { %p1969_p2 = pnand %p1968_p12, %p1962_p3 }
 0xac7   : > { %v1266_v17 = vpop.permute.xlu0 %1265 }
 0xac8   : > { %v1264_v20 = vpop.permute.xlu1 %1263  ;;  %v1276_v63 = vsel %vm1274_vm4, %v1273_v21, %v1266_v17 }
 0xac9   : > { %v1275_v22 = vsel %vm1274_vm4, %v1272_v19, %v1264_v20 }
 0xaca   : > { %1646 = vmatprep.mubr.msk.f32.mxu1 %vm303_vm0, %v1275_v22 }
 0xacb   : > { %1647 = vmatmul.mubr.msk.f32.vlgmr.msra.gmra.mrb[8].mxu1 %vm303_vm0, %v1276_v63 }
 0xb9e   : > { %v1648_v37 = vpop.f32.mrb[8].mxu1 }
 0xb9f   : > { %v1370_v23 = vadd.f32 %v1648_v37, %v1522_v38  ;;  %v1364_v24 = vpop.f32.mrb[9].mxu1 }
 0xba0   : > { %v1365_v25 = vadd.f32 %v1522_v38, %v1364_v24 }
 0xba1   : > { %1374 = vst.msk [vmem:[%s298_s7 + $0x8] sm:$0xff] %vm303_vm0, %v1370_v23 }
 0xba2   : > { %1373 = vst.msk [vmem:[%s298_s7] sm:$0xff] %vm303_vm0, %v1365_v25 }
 0xba3   : > { %1972 = shalt.err (!%p1969_p2)
}
 0xba4   : > { %s1973_s10 = scalar_lea.hbm %s2404_s19, 256  ;;  %s1977_s27 = scalar_lea.hbm %s2456_s6, 512 }
 0xba5   : > { %p1974_p13 = scmp.ne.s32.totalorder %s2404_s19, %s1973_s10  ;;  %p1978_p4 = scmp.lt.u32.totalorder %s2404_s19, %s2456_s6 }
 0xba6   : > { %p1979_p7 = scmp.lt.u32.totalorder %s1977_s27, %s1973_s10  ;;  %p1981_p11 = scmp.lt.u32.totalorder %s1973_s10, %s2404_s19 }
 0xba7   : > { %p1975_p6 = pnand %p1974_p13, %p2472_p0 }
 0xba8   : > { %p1980_p8 = por %p1979_p7, %p1978_p4 }
 0xba9   : > { %p1976_p10 = pneg %p1975_p6 }
 0xbaa   : > { %p1982_p1 = por %p1981_p11, %p1980_p8 }
 0xbac   : > { %p1983_p3 = pnand %p1982_p1, %p1976_p10 }
 0xbae   : > { %1986 = shalt.err (!%p1983_p3)
}
 0xbaf   : > { %s2047_s18 = smov 128   ;;  %s2048_s16 = smov 8  }
 0xbb0   : > { %1731 = dma.vmem_to_hbm [thread:$0]  (%p2472_p0), %s2399_s20, 256, %s2404_s19, %s1376_s14, %s2047_s18, %s2047_s18, %s2048_s16  }
 0xbb1 PF: > { %s1404_s25 = sand.u32 1, %s2017_s21   ;;  %p2473_p5 = scmp.ne.s32.totalorder %s2461_s28, 0 }
 0xbb2   : > { %p2474_p9 = scmp.ge.s32.totalorder %s2029_s24, 2  ;;  %s1405_s30 = scalar_lea.sflag [#allocation4], %s1404_s25 }
 0xbb4   : > { %p1745_p12 = pnand %p2474_p9, %p2473_p5 }
 0xbb6   : > { %2012 = dma.done.wait (!%p1745_p12), %s1405_s30, 256  }
 0xbb7   : > { %2014 = vsyncadd (!%p1745_p12), %s1405_s30, 4294967040  ;;  %p20_p2 = scmp.ge.s32.totalorder %s2197_s26, 4   ;;  %s2475_s21 = smov %s2021_s22 }
 0xbb8   : > { %s2476_s22 = smov %s2025_s23  ;;  %s2477_s23 = smov %s2206_s11 }
 0xbb9   : > { %s2478_s24 = smov %s2197_s26  ;;  %22 = sbr.rel (!%p20_p2) target bundleno = 6 (0x6), region = 97 }
 0xbc0   :  { %1410 = vsyncpa [#allocation3], 1 }
 0xbc1   :  { %1412 = vsyncpa [#allocation3 + $0x1], 1 }
 0xbc2   :  { %1413 = vsyncpa [#allocation6], 1 }
 0xbc3   :  { %1414 = vsyncpa [#allocation4], 1 }
 0xbc4   :  { %1416 = vsyncpa [#allocation4 + $0x1], 1 }

</bundles_post_ra>
